<compile_context>
chip_gen: v5e
topology: v5e:2x2
jax: 0.10.0
libtpu: 0.0.40
codegen_flags: <defaults>
</compile_context>

<pallas_src>
import math
import functools

import numpy as np
import jax
import jax.numpy as jnp
from jax.experimental import pallas as pl
from jax.experimental.pallas import tpu as pltpu


# ------------------------------ Pallas kernel ------------------------------

def _posenc_kernel(pos_ref, freq_ref, o_ref):
    # pos_ref:  (TM, 1)        f32 positions for this row tile
    # freq_ref: (1, d_model)   f32, freq[2i] = freq[2i+1] = div_term[i]
    # o_ref:    (TM, d_model)  f32 output tile
    arg = pos_ref[...] * freq_ref[...]                        # VPU broadcast -> (TM, D)
    lane = jax.lax.broadcasted_iota(jnp.int32, arg.shape, dimension=1)
    even = (lane & 1) == 0
    # sin on even feature indices, cos on odd -- exactly the torch formula.
    o_ref[...] = jnp.where(even, jnp.sin(arg), jnp.cos(arg)).astype(o_ref.dtype)


# ------------------------------ wrapper ------------------------------

def _round_up(x, m):
    return ((x + m - 1) // m) * m


def _choose_row_tile(M, d_model, *, max_tile=1024, vmem_budget=24 << 20):
    # Double-buffered (output + position) blocks must fit the VMEM budget.
    bytes_per_row = (d_model + 1) * 4 * 2          # f32, x2 for double buffering
    cap_vmem = max(8, (vmem_budget // bytes_per_row) // 8 * 8)
    # Prefer >= 2 grid steps so both TensorCores get work under "parallel".
    cap_split = max(8, _round_up(pl.cdiv(M, 2), 8))
    return max(8, min(max_tile, cap_vmem, cap_split))


def positional_encoder(position, d_model):
    """position: (B, L) -> pe: (B, L, d_model) float32."""
    assert d_model % 2 == 0, "d_model must be even (as the torch module assumes)"
    B, L = position.shape
    M = B * L

    # div_term, duplicated per feature lane so the kernel needs no interleave.
    # Built with numpy -> literal constant under jit (no runtime prologue ops).
    half_idx = np.arange(0, d_model, 2, dtype=np.float32)
    div_term = np.exp(half_idx * (-math.log(10000.0) / d_model))   # (d_model//2,)
    freq_full = jnp.asarray(np.repeat(div_term, 2).reshape(1, d_model))

    pos = position.astype(jnp.float32).reshape(M, 1)

    tm = _choose_row_tile(M, d_model)
    m_pad = _round_up(M, tm)
    if m_pad != M:
        pos = jnp.pad(pos, ((0, m_pad - M), (0, 0)))  # padded rows sliced off below

    out = pl.pallas_call(
        _posenc_kernel,
        grid=(m_pad // tm,),
        in_specs=[
            pl.BlockSpec((tm, 1), lambda i: (i, 0)),          # per-tile positions
            pl.BlockSpec((1, d_model), lambda i: (0, 0)),     # resident freq row
        ],
        out_specs=pl.BlockSpec((tm, d_model), lambda i: (i, 0)),
        out_shape=jax.ShapeDtypeStruct((m_pad, d_model), jnp.float32),
        compiler_params=pltpu.CompilerParams(
            dimension_semantics=("parallel",),
            vmem_limit_bytes=32 * 1024 * 1024,
        ),
    )(pos, freq_full)

    return out[:M].reshape(B, L, d_model)


# ------------------------------ pure-JAX reference ------------------------------

def positional_encoder_ref(position, d_model):
    B, L = position.shape
    div_term = jnp.exp(
        jnp.arange(0, d_model, 2, dtype=jnp.float32) * (-math.log(10000.0) / d_model)
    )
    arg = position.astype(jnp.float32)[..., None] * div_term        # (B, L, d_model//2)
    pe = jnp.zeros((B, L, d_model), jnp.float32)
    pe = pe.at[..., 0::2].set(jnp.sin(arg))
    pe = pe.at[..., 1::2].set(jnp.cos(arg))
    return pe


# ------------------------------ main ------------------------------

if __name__ == "__main__":
    key = jax.random.PRNGKey(0)
    B, L, D_MODEL = 2, 8, 32
    MAX_LEN = 1000  # buffer bound of the torch module; forward itself never uses it

    # Integer timestep-like positions in [0, MAX_LEN), as floats (matches usage).
    position = jax.random.randint(key, (B, L), 0, MAX_LEN).astype(jnp.float32)

    fwd = jax.jit(functools.partial(positional_encoder, d_model=D_MODEL))
    pe = jax.block_until_ready(fwd(position))

    assert pe.shape == (B, L, D_MODEL), pe.shape
    ref = positional_encoder_ref(position, D_MODEL)
    np.testing.assert_allclose(np.asarray(pe), np.asarray(ref), rtol=1e-4, atol=1e-4)
    assert bool(jnp.all(jnp.isfinite(pe)))
    print("KERNEL_OK")
</pallas_src>

<mosaic_0001>
module attributes {stable_mosaic.version = 11 : i64} {
  func.func @_posenc_kernel(%arg0: i32, %arg1: memref<8x1xf32, #tpu.memory_space<vmem>>, %arg2: memref<1x32xf32, #tpu.memory_space<vmem>>, %arg3: memref<8x32xf32, #tpu.memory_space<vmem>>) attributes {dimension_semantics = [#tpu.dimension_semantics<parallel>], iteration_bounds = array<i64: 2>, scalar_prefetch = 0 : i64, scratch_operands = 0 : i64, tpu.core_type = #tpu.core_type<tc>, window_params = [{transform_indices = @transform_0, window_bounds = array<i64: 8, 1>}, {pipeline_mode = #tpu.pipeline_mode<synchronous>, transform_indices = @transform_1, window_bounds = array<i64: 1, 32>}, {transform_indices = @transform_2, window_bounds = array<i64: 8, 32>}]} {
    %c0 = arith.constant 0 : index
    %c0_0 = arith.constant 0 : index
    %0 = vector.load %arg1[%c0, %c0_0] : memref<8x1xf32, #tpu.memory_space<vmem>>, vector<8x1xf32>
    %c0_1 = arith.constant 0 : index
    %c0_2 = arith.constant 0 : index
    %1 = vector.load %arg2[%c0_1, %c0_2] : memref<1x32xf32, #tpu.memory_space<vmem>>, vector<1x32xf32>
    %2 = vector.broadcast %0 : vector<8x1xf32> to vector<8x32xf32>
    %3 = vector.broadcast %1 : vector<1x32xf32> to vector<8x32xf32>
    %4 = arith.mulf %2, %3 : vector<8x32xf32>
    %5 = tpu.iota {dimensions = array<i32: 1>} : vector<8x32xi32>
    %c1_i32 = arith.constant 1 : i32
    %6 = vector.broadcast %c1_i32 : i32 to vector<8x32xi32>
    %7 = arith.andi %5, %6 : vector<8x32xi32>
    %c0_i32 = arith.constant 0 : i32
    %8 = vector.broadcast %c0_i32 : i32 to vector<8x32xi32>
    %9 = arith.cmpi eq, %7, %8 : vector<8x32xi32>
    %10 = math.sin %4 : vector<8x32xf32>
    %11 = math.cos %4 : vector<8x32xf32>
    %12 = arith.select %9, %10, %11 : vector<8x32xi1>, vector<8x32xf32>
    %c0_3 = arith.constant 0 : index
    %c0_4 = arith.constant 0 : index
    %13 = vector.load %arg3[%c0_3, %c0_4] : memref<8x32xf32, #tpu.memory_space<vmem>>, vector<8x32xf32>
    tpu.vector_store %arg3[%c0_3, %c0_4], %12 {strides = array<i32>} : memref<8x32xf32, #tpu.memory_space<vmem>>, vector<8x32xf32>,
    return
  }
  func.func @transform_0(%arg0: i32) -> (i32, i32) {
    %c0_i32 = arith.constant 0 : i32
    %c0_i32_0 = arith.constant 0 : i32
    return %arg0, %c0_i32 : i32, i32
  }
  func.func @transform_1(%arg0: i32) -> (i32, i32) {
    %c0_i32 = arith.constant 0 : i32
    %c0_i32_0 = arith.constant 0 : i32
    %c0_i32_1 = arith.constant 0 : i32
    return %c0_i32, %c0_i32_0 : i32, i32
  }
  func.func @transform_2(%arg0: i32) -> (i32, i32) {
    %c0_i32 = arith.constant 0 : i32
    %c0_i32_0 = arith.constant 0 : i32
    return %arg0, %c0_i32 : i32, i32
  }
}

</mosaic_0001>

<bundles_post_ra>
// kernel: positional_encoder.1
= control target key start
LH: loop header
LB: loop body
LE: loop exit
PB: predicated region body
PF: predicated region fallthrough
CT: control target
= control target key end

     0   :  { %7 = vsyncpa [#allocation3], 0  ;;  %s857_s0 = inlined_call_operand.vmem [shape: f32[16,1], index: 0, kind: input, shape index: {}]   ;;  %s858_s1 = inlined_call_operand.vmem [shape: f32[1,32], index: 1, kind: input, shape index: {}]   ;;  %s859_s2 = inlined_call_operand.hbm [shape: f32[16,32], index: 2, kind: output, shape index: {}]  }
   0x1   :  { %9 = vsyncpa [#allocation3 + $0x1], 0  ;;  %s691_s9 = smov 0   ;;  %s693_s10 = smov 0  }
   0x2   :  { %s695_s11 = smov 0   ;;  %s697_s12 = smov 0  }
   0x3 LB: > { %s712_s13 = sadd.s32 4294967295, %s667_s12   ;;  %s541_s14 = sadd.s32 4294967294, %s667_s12   ;;  %s667_s12 = sphi %s697_s12, %s867_s12   ;;  %s663_s11 = sphi %s695_s11, %s866_s11   ;;  %s659_s10 = sphi %s693_s10, %s865_s10   ;;  %s655_s9 = sphi %s691_s9, %s864_s9  }
   0x4   : > { %s716_s15 = sadd.s32 1, %s667_s12   ;;  %s69_s16 = sadd.s32 1, %s663_s11 }
   0x5   : > { %s66_s17 = ssub.s32 %s667_s12, %s716_s15  ;;  %p79_p0 = scmp.ne.s32.totalorder %s663_s11, %s659_s10 }
   0x6   : > { %p67_p1 = scmp.eq.s32.totalorder %s66_s17, 0  ;;  %p80_p2 = scmp.eq.s32.totalorder %s712_s13, 1 }
   0x7   : > { %p85_p3 = scmp.ne.s32.totalorder %s659_s10, %s655_s9  ;;  %p86_p4 = scmp.eq.s32.totalorder %s541_s14, 1 }
   0x8   : > { %s727_s18 = scalar_select %p67_p1, %s663_s11, %s69_s16  }
   0x9   : > { %p729_p5 = por %p80_p2, %p79_p0  ;;  %p733_p6 = por %p86_p4, %p85_p3 }
   0xa   : > { %p544_p7 = scmp.ge.s32.totalorder %s667_s12, 1  ;;  %p114_p8 = scmp.lt.s32.totalorder %s667_s12, 3 }
   0xc   : > { %p115_p9 = pnand %p544_p7, %p114_p8 }
   0xd   : > { %p135_p10 = scmp.lt.s32.totalorder (!%p115_p9), %s712_s13, 1  ;;  %s132_s28 = sand.u32 (!%p115_p9), 1, %s659_s10  }
   0xe   : > { %118 = sbr.rel (%p115_p9) target bundleno = 241 (0xf1), region = 28  ;;  %s810_s29 = sshll.u32 (!%p115_p9), %s132_s28, 3 }
   0xf   : > { %s554_s30 = sshll.u32 (!%p115_p9), %s712_s13, 3  ;;  %s134_s6 = scalar_lea.vmem (!%p115_p9), [#allocation2], %s810_s29 }
  0x10   : > { %s477_s5 = scalar_lea.hbm (!%p115_p9), %s859_s2, %s554_s30  ;;  %s821_s7 = sshll.u32 (!%p115_p9), %s134_s6, 4  ;;  %s480_s7 = int_to_ptr.vmem [resolvable:$true] %s821_s7 }
  0x11   : > { %s481_s8 = sshll.u32 (!%p115_p9), %s477_s5, 4  ;;  %s482_s8 = int_to_ptr.hbm [resolvable:$true] %s481_s8 }
  0x12   : > { %s619_s14 = sshra.s32 (!%p115_p9), %s482_s8, 4  ;;  %s620_s14 = int_to_ptr.hbm [resolvable:$true] %s619_s14 }
  0x13   : > { %v669_v0 = vmov 0   ;;  %s136_s21 = scalar_select %p135_p10, %s712_s13, 1  ;;  %v604_v2 = vld [vmem:[%s858_s1] ss:$0 sm:$0xff]  ;;  %v670_v16 = vmov 683565275  }
  0x14   : > { %603 = vset.pattern.permute.xlu0 %v669_v0  ;;  %v671_v18 = vmov 2475754826   ;;  %v672_v21 = vmov 2131351028   ;;  %v673_v24 = vmov 2102212464   ;;  %p626_p0 = scmp.lt.s32.totalorder %s620_s14, %s859_s2 }
  0x15   : > { %s546_s22 = sshll.u32 %s136_s21, 3  ;;  %v674_v27 = vmov 920167782   ;;  %v675_v30 = vmov 1326507024   ;;  %s467_s13 = scalar_lea.sflag [#allocation3], %s132_s28 }
  0x16   : > { %s138_s25 = scalar_lea.vmem %s857_s0, %s546_s22  ;;  %s621_s16 = scalar_lea.hbm %s620_s14, 8 }
  0x17   : > { %v139_v1 = vld [vmem:[%s138_s25] sm:$0xff]  ;;  %p622_p11 = scmp.ne.s32.totalorder %s620_s14, %s621_s16  ;;  %s625_s22 = scalar_lea.hbm %s859_s2, 16 }
  0x18   : > { %143 = vperm.xlu0 %603, %v139_v1   ;;  %p627_p1 = scmp.lt.s32.totalorder %s625_s22, %s621_s16 }
  0x19   : > { %p623_p12 = pnand %p622_p11, %p729_p5 }
  0x1a   : > { %p628_p2 = por %p627_p1, %p626_p0 }
  0x1b   : > { %p624_p13 = pneg %p623_p12 }
  0x1d   : > { %p629_p3 = pnand %p628_p2, %p624_p13 }
  0x8a   : > { %v144_v3 = vpop.permute.xlu0 %143 }
  0x8b   : > { %v748_v4 = vmul.f32 %v604_v2, %v144_v3 }
  0x8d   : > { %v157_v5 = vand.u32 2139095040, %v748_v4  ;;  %v154_v8 = vand.u32 2147483647, %v748_v4  ;;  %vm156_vm12 = vcmp.lt.s32.totalorder %v748_v4, 0 }
  0x8f   : > { %v158_v6 = vshrl.u32 %v157_v5, 23  ;;  %v161_v10 = vand.u32 8388607, %v154_v8  ;;  %vm155_vm13 = vcmp.le.f32.partialorder %v154_v8, 0.7853982 }
  0x91   : > { %v547_v7 = vadd.s32 4294967169, %v158_v6  ;;  %v162_v14 = vor.u32 8388608, %v161_v10 }
  0x93   : > { %v164_v9 = vadd.s32 1, %v547_v7  ;;  %v765_v37 = vshll.u32 %v162_v14, 8 }
  0x95   : > { %vm165_vm0 = vcmp.gt.s32.totalorder %v164_v9, 0  ;;  %v203_v46 = vand.u32 65535, %v765_v37  ;;  %v204_v47 = vshrl.u32 %v765_v37, 16 }
  0x96   : > { %v166_v11 = vsel %vm165_vm0, %v164_v9, 0 }
  0x97   : > { %v168_v12 = vand.u32 31, %v166_v11  ;;  %v756_v15 = vshrl.u32 %v166_v11, 5 }
  0x99   : > { %v754_v13 = vsub.s32 32, %v168_v12  ;;  %v171_v17 = vshll.u32 %v670_v16, %v168_v12  ;;  %v174_v19 = vshll.u32 %v671_v18, %v168_v12  ;;  %v177_v23 = vshll.u32 %v672_v21, %v168_v12 }
  0x9a   : > { %v180_v26 = vshll.u32 %v673_v24, %v168_v12  ;;  %v183_v29 = vshll.u32 %v674_v27, %v168_v12  ;;  %vm186_vm1 = vcmp.lt.s32.totalorder %v756_v15, 1  ;;  %vm189_vm2 = vcmp.lt.s32.totalorder %v756_v15, 4 }
  0x9b   : > { %v172_v20 = vshrl.u32 %v671_v18, %v754_v13  ;;  %v175_v22 = vshrl.u32 %v672_v21, %v754_v13  ;;  %v178_v25 = vshrl.u32 %v673_v24, %v754_v13  ;;  %v181_v28 = vshrl.u32 %v674_v27, %v754_v13 }
  0x9c   : > { %v184_v31 = vshrl.u32 %v675_v30, %v754_v13  ;;  %vm188_vm3 = vcmp.lt.s32.totalorder %v756_v15, 3  ;;  %vm187_vm4 = vcmp.lt.s32.totalorder %v756_v15, 2  ;;  %v170_v11 = vshrl.u32 %v670_v16, %v754_v13 }
  0x9d   : > { %v173_v32 = vor.u32 %v172_v20, %v171_v17  ;;  %v176_v33 = vor.u32 %v175_v22, %v174_v19  ;;  %v179_v34 = vor.u32 %v178_v25, %v177_v23  ;;  %v182_v35 = vor.u32 %v181_v28, %v180_v26 }
  0x9e   : > { %v185_v36 = vor.u32 %v184_v31, %v183_v29 }
  0x9f   : > { %v194_v38 = vsel %vm186_vm1, %v173_v32, %v176_v33  ;;  %v198_v39 = vsel %vm186_vm1, %v176_v33, %v179_v34  ;;  %v195_v40 = vsel %vm189_vm2, %v182_v35, 920167782  ;;  %v191_v7 = vsel %vm189_vm2, %v179_v34, 2102212464 }
  0xa0   : > { %v199_v41 = vsel %vm189_vm2, %v185_v36, 1326507024  ;;  %v196_v42 = vsel %vm188_vm3, %v179_v34, %v195_v40  ;;  %v190_v20 = vsel %vm186_vm1, %v170_v11, %v173_v32  ;;  %v192_v21 = vsel %vm188_vm3, %v176_v33, %v191_v7 }
  0xa1   : > { %v200_v43 = vsel %vm188_vm3, %v182_v35, %v199_v41  ;;  %v197_v44 = vsel %vm187_vm4, %v194_v38, %v196_v42  ;;  %v193_v13 = vsel %vm187_vm4, %v190_v20, %v192_v21 }
  0xa2   : > { %v201_v45 = vsel %vm187_vm4, %v198_v39, %v200_v43  ;;  %v227_v50 = vand.u32 65535, %v197_v44  ;;  %v228_v51 = vshrl.u32 %v197_v44, 16  ;;  %v247_v28 = vmul.u32 %v765_v37, %v193_v13 }
  0xa3   : > { %v205_v48 = vand.u32 65535, %v201_v45  ;;  %v206_v49 = vshrl.u32 %v201_v45, 16 }
  0xa4   : > { %v230_v54 = vmul.u32 %v228_v51, %v203_v46  ;;  %v231_v55 = vmul.u32 %v227_v50, %v204_v47  ;;  %v229_v59 = vmul.u32 %v227_v50, %v203_v46  ;;  %v232_v63 = vmul.u32 %v228_v51, %v204_v47 }
  0xa5   : > { %v208_v52 = vmul.u32 %v206_v49, %v203_v46  ;;  %v209_v53 = vmul.u32 %v205_v48, %v204_v47  ;;  %v207_v56 = vmul.u32 %v205_v48, %v203_v46  ;;  %v210_v58 = vmul.u32 %v206_v49, %v204_v47 }
  0xa6   : > { %v233_v60 = vshll.u32 %v230_v54, 16  ;;  %v235_v2 = vshll.u32 %v231_v55, 16  ;;  %v234_v18 = vshrl.u32 %v230_v54, 16  ;;  %v236_v24 = vshrl.u32 %v231_v55, 16 }
  0xa7   : > { %v211_v57 = vshll.u32 %v208_v52, 16  ;;  %v213_v61 = vshll.u32 %v209_v53, 16  ;;  %v212_v12 = vshrl.u32 %v208_v52, 16  ;;  %v214_v22 = vshrl.u32 %v209_v53, 16 }
  0xa8   : > { %vm237_vm6 = vc.u32 %v229_v59, %v233_v60  ;;  %v239_v3 = vadd.s32 %v233_v60, %v229_v59 }
  0xa9   : > { %vm215_vm5 = vc.u32 %v207_v56, %v211_v57  ;;  %v217_v62 = vadd.s32 %v211_v57, %v207_v56  ;;  %v238_v6 = vsel %vm237_vm6, 1, %v669_v0  ;;  %vm464_vm6 = vcmask 261120  }
  0xaa   : > { %v216_v1 = vsel %vm215_vm5, 1, %v669_v0  ;;  %v240_v10 = vadd.s32 %v238_v6, %v232_v63  ;;  %vm241_vm8 = vc.u32 %v239_v3, %v235_v2  ;;  %v243_v27 = vadd.s32 %v239_v3, %v235_v2 }
  0xab   : > { %v218_v5 = vadd.s32 %v216_v1, %v210_v58  ;;  %vm219_vm7 = vc.u32 %v217_v62, %v213_v61  ;;  %v242_v17 = vsel %vm241_vm8, 1, %v669_v0  ;;  %v150_v61 = vlaneseq }
  0xac   : > { %v220_v9 = vsel %vm219_vm7, 1, %v669_v0  ;;  %v244_v19 = vadd.s32 %v242_v17, %v240_v10  ;;  %vm297_vm5 = vweird.f32 %v748_v4 }
  0xad   : > { %v222_v14 = vadd.s32 %v220_v9, %v218_v5  ;;  %v151_v8 = vand.u32 127, %v150_v61 }
  0xae   : > { %v245_v25 = vadd.s32 %v244_v19, %v234_v18 }
  0xaf   : > { %v223_v23 = vadd.s32 %v222_v14, %v212_v12  ;;  %v152_v12 = vand.u32 1, %v151_v8 }
  0xb0   : > { %v246_v16 = vadd.s32 %v245_v25, %v236_v24 }
  0xb1   : > { %v224_v26 = vadd.s32 %v223_v23, %v214_v22  ;;  %vm816_vm1 = vcmp.eq.s32.totalorder %v152_v12, 0 }
  0xb2   : > { %v250_v0 = vadd.s32 1, %v246_v16 }
  0xb3   : > { %vm249_vm9 = vc.u32 %v224_v26, %v243_v27  ;;  %v248_v15 = vadd.s32 %v243_v27, %v224_v26 }
  0xb4   : > { %v251_v29 = vsel %vm249_vm9, %v250_v0, %v246_v16 }
  0xb5   : > { %v252_v30 = vadd.s32 %v251_v29, %v247_v28 }
  0xb7   : > { %v253_v31 = vadd.s32 536870912, %v252_v30 }
  0xb9   : > { %v254_v32 = vshrl.u32 %v253_v31, 30 }
  0xbb   : > { %v255_v34 = vshll.u32 %v254_v32, 30  ;;  %v278_v53 = vsub.s32 4, %v254_v32 }
  0xbd   : > { %v256_v33 = vsub.s32 %v252_v30, %v255_v34  ;;  %v279_v58 = vsel %vm156_vm12, %v278_v53, %v254_v32 }
  0xbe   : > { %v281_v62 = vsel %vm155_vm13, 0, %v279_v58 }
  0xbf   : > { %vm257_vm10 = vcmp.lt.s32.totalorder %v256_v33, 0  ;;  %v258_v35 = vsub.s32 0, %v256_v33  ;;  %v298_v5 = vadd.s32 3, %v281_v62  ;;  %v453_v11 = vand.u32 3, %v281_v62 }
  0xc1   : > { %v259_v36 = vsel %vm257_vm10, %v258_v35, %v256_v33  ;;  %v299_v14 = vand.u32 3, %v298_v5  ;;  %vm454_vm14 = vcmp.lt.s32.totalorder %v453_v11, 2  ;;  %vm455_vm15 = vcmp.eq.s32.totalorder %v453_v11, 0 }
  0xc2   : > { %v260_v38 = vclz %v259_v36  ;;  %vm458_vm0 = vcmp.eq.s32.totalorder %v453_v11, 2 }
  0xc3   : > { %vm300_vm2 = vcmp.lt.s32.totalorder %v299_v14, 2  ;;  %vm301_vm3 = vcmp.eq.s32.totalorder %v299_v14, 0  ;;  %vm304_vm4 = vcmp.eq.s32.totalorder %v299_v14, 2 }
  0xc4   : > { %v548_v39 = vadd.s32 4294967294, %v260_v38 }
  0xc6   : > { %vm549_vm11 = vcmp.lt.s32.totalorder %v548_v39, 0 }
  0xc7   : > { %v263_v40 = vsel %vm549_vm11, 0, %v548_v39 }
  0xc8   : > { %v264_v41 = vsub.s32 32, %v263_v40  ;;  %v268_v42 = vsub.s32 4294967266, %v263_v40  ;;  %v265_v43 = vshll.u32 %v256_v33, %v263_v40 }
  0xca   : > { %v266_v44 = vshrl.u32 %v248_v15, %v264_v41  ;;  %v269_v45 = vadd.s32 127, %v268_v42 }
  0xcc   : > { %v267_v37 = vor.u32 %v266_v44, %v265_v43  ;;  %v270_v46 = vshll.u32 %v269_v45, 23 }
  0xce   : > { %v271_v47 = vor.u32 4788187, %v270_v46  ;;  %v274_v49 = vcvt.s32.f32 %v267_v37 }
  0xd0   : > { %v272_v48 = vand.u32 2147483647, %v271_v47 }
  0xd2   : > { %v275_v50 = vmul.f32 %v274_v49, %v272_v48 }
  0xd4   : > { %v276_v51 = vxor.u32 2147483648, %v275_v50 }
  0xd6   : > { %v277_v52 = vsel %vm156_vm12, %v276_v51, %v275_v50 }
  0xd7   : > { %v280_v54 = vsel %vm155_vm13, %v748_v4, %v277_v52 }
  0xd8   : > { %v282_v55 = vmul.f32 %v280_v54, %v280_v54 }
  0xda   : > { %v290_v56 = vmul.f32 -0.00019511016, %v282_v55  ;;  %v283_v57 = vmul.f32 -0.001358992, %v282_v55 }
  0xdc   : > { %v291_v59 = vadd.f32 0.008332121, %v290_v56  ;;  %v284_v60 = vadd.f32 0.041655596, %v283_v57 }
  0xde   : > { %v292_v63 = vmul.f32 %v291_v59, %v282_v55  ;;  %v285_v1 = vmul.f32 %v284_v60, %v282_v55 }
  0xe0   : > { %v293_v2 = vadd.f32 -0.16666654, %v292_v63  ;;  %v286_v3 = vadd.f32 -0.4999988, %v285_v1 }
  0xe2   : > { %v294_v6 = vmul.f32 %v293_v2, %v282_v55  ;;  %v287_v7 = vmul.f32 %v286_v3, %v282_v55 }
  0xe4   : > { %v295_v9 = vadd.f32 1.0, %v294_v6  ;;  %v288_v10 = vadd.f32 1.0, %v287_v7 }
  0xe6   : > { %v296_v17 = vmul.f32 %v295_v9, %v280_v54  ;;  %v305_v18 = vxor.u32 2147483648, %v288_v10 }
  0xe8   : > { %v302_v19 = vxor.u32 2147483648, %v296_v17  ;;  %v306_v22 = vsel %vm304_vm4, %v305_v18, %v296_v17  ;;  %v460_v24 = vsel %vm458_vm0, %v305_v18, %v296_v17 }
  0xea   : > { %v303_v21 = vsel %vm301_vm3, %v288_v10, %v302_v19  ;;  %v457_v23 = vsel %vm455_vm15, %v288_v10, %v302_v19 }
  0xeb   : > { %v307_v25 = vsel %vm300_vm2, %v303_v21, %v306_v22  ;;  %v461_v26 = vsel %vm454_vm14, %v457_v23, %v460_v24 }
  0xec   : > { %v308_v27 = vsel %vm297_vm5, nan, %v307_v25  ;;  %v462_v13 = vsel %vm297_vm5, nan, %v461_v26 }
  0xed   : > { %v463_v16 = vsel %vm816_vm1, %v308_v27, %v462_v13 }
  0xee   : > { %465 = vst.msk [vmem:[%s134_s6] sm:$0xff] %vm464_vm6, %v463_v16 }
  0xef   : > { %632 = shalt.err (!%p629_p3)
}
  0xf0   : > { %557 = dma.vmem_to_hbm [thread:$0]  (%p729_p5), %s480_s7, 128, %s482_s8, %s467_s13  }
  0xf1 PF: > { %p563_p4 = scmp.ge.s32.totalorder %s667_s12, 2  ;;  %s493_s25 = sand.u32 1, %s655_s9  }
  0xf2   : > { %s494_s26 = scalar_lea.sflag [#allocation3], %s493_s25 }
  0xf3   : > { %p560_p7 = pnand %p563_p4, %p733_p6 }
  0xf5   : > { %p561_p8 = pneg %p560_p7 }
  0xf7   : > { %650 = dma.done.wait (%p561_p8), %s494_s26, 128  }
  0xf8   : > { %652 = vsyncadd (%p561_p8), %s494_s26, 4294967168  ;;  %p12_p9 = scmp.ge.s32.totalorder %s716_s15, 4   ;;  %s864_s9 = smov %s659_s10 }
  0xf9   : > { %s865_s10 = smov %s663_s11  ;;  %s866_s11 = smov %s727_s18 }
  0xfa   : > { %s867_s12 = smov %s716_s15  ;;  %14 = sbr.rel (!%p12_p9) target bundleno = 3 (0x3), region = 63 }
  0xff   :  { %500 = vsyncpa [#allocation3], 1 }
 0x100   :  { %502 = vsyncpa [#allocation3 + $0x1], 1 }

</bundles_post_ra>
